<compile_context>
chip_gen: v5e
topology: v5e:2x2
jax: 0.10.0
libtpu: 0.0.40
codegen_flags: <defaults>
</compile_context>

<pallas_src>
import functools

import jax
import jax.numpy as jnp
from jax.experimental import pallas as pl
from jax.experimental.pallas import tpu as pltpu


def _round_up(x, m):
    return (x + m - 1) // m * m


# ---------------------------------------------------------------------------
# Tiled matmul kernel:  o = x @ w   (x: (M, K), w: (K, N)), bf16 MXU, f32 acc.
# ---------------------------------------------------------------------------
def _matmul_kernel(x_ref, w_ref, o_ref, acc_ref):
    @pl.when(pl.program_id(2) == 0)
    def _():
        acc_ref[...] = jnp.zeros_like(acc_ref)

    acc_ref[...] += jnp.dot(
        x_ref[...].astype(jnp.bfloat16),
        w_ref[...].astype(jnp.bfloat16),
        preferred_element_type=jnp.float32,
    )

    @pl.when(pl.program_id(2) == pl.num_programs(2) - 1)
    def _():
        o_ref[...] = acc_ref[...].astype(o_ref.dtype)


def pallas_linear(x, w, *, out_dtype=jnp.bfloat16, tm=256, tn=256, tk=512):
    """x: (M, K), w: (K, N) -> (M, N) in out_dtype. Pads to tile multiples."""
    M, K = x.shape
    K2, N = w.shape
    assert K == K2

    # Tile sizes: 128/256-aligned for the MXU, shrink for small problems.
    tm_e = min(tm, _round_up(M, 16))
    tk_e = min(tk, _round_up(K, 128))
    tn_e = min(tn, _round_up(N, 128))
    Mp, Kp, Np = _round_up(M, tm_e), _round_up(K, tk_e), _round_up(N, tn_e)

    xp = x if (Mp == M and Kp == K) else jnp.pad(x, ((0, Mp - M), (0, Kp - K)))
    wp = w if (Kp == K and Np == N) else jnp.pad(w, ((0, Kp - K), (0, Np - N)))

    grid = (Mp // tm_e, Np // tn_e, Kp // tk_e)
    out = pl.pallas_call(
        _matmul_kernel,
        out_shape=jax.ShapeDtypeStruct((Mp, Np), out_dtype),
        grid_spec=pltpu.PrefetchScalarGridSpec(
            num_scalar_prefetch=0,
            grid=grid,
            in_specs=[
                pl.BlockSpec((tm_e, tk_e), lambda i, j, k: (i, k)),
                pl.BlockSpec((tk_e, tn_e), lambda i, j, k: (k, j)),
            ],
            out_specs=pl.BlockSpec((tm_e, tn_e), lambda i, j, k: (i, j)),
            scratch_shapes=[pltpu.VMEM((tm_e, tn_e), jnp.float32)],
        ),
        compiler_params=pltpu.CompilerParams(
            dimension_semantics=("parallel", "parallel", "arbitrary")
        ),
    )(xp, wp)

    if Mp == M and Np == N:
        return out
    return out[:M, :N]


# ---------------------------------------------------------------------------
# Attention kernel: one batch per grid step, all heads processed in-kernel.
#   q,k,v refs: (1, T, H*D) bf16;  o ref: (1, T, H*D)  (final 'b t (h d)' layout)
# ---------------------------------------------------------------------------
def _attn_kernel(scale, heads, dim_head, q_ref, k_ref, v_ref, o_ref):
    q_all = q_ref[0].astype(jnp.bfloat16)   # (T, H*D)
    k_all = k_ref[0].astype(jnp.bfloat16)
    v_all = v_ref[0].astype(jnp.bfloat16)

    for h in range(heads):                  # static unroll over heads
        lo = h * dim_head
        q = jax.lax.slice_in_dim(q_all, lo, lo + dim_head, axis=1)  # (T, D)
        k = jax.lax.slice_in_dim(k_all, lo, lo + dim_head, axis=1)
        v = jax.lax.slice_in_dim(v_all, lo, lo + dim_head, axis=1)

        # scores: (T, T) = q @ k^T, scaled
        s = jax.lax.dot_general(
            q, k, (((1,), (1,)), ((), ())), preferred_element_type=jnp.float32
        ) * scale
        # numerically-stable softmax; reciprocal on the EUP slot.
        s = s - jnp.max(s, axis=-1, keepdims=True)
        p = jnp.exp(s)
        p = p * pl.reciprocal(jnp.sum(p, axis=-1, keepdims=True), approx=True)

        o = jnp.dot(p.astype(jnp.bfloat16), v, preferred_element_type=jnp.float32)
        # write head h into its column range of the lane-dense output block
        o_ref[0, :, lo:lo + dim_head] = o.astype(o_ref.dtype)


def pallas_attention(q, k, v, scale, heads, dim_head):
    """q, k, v: (B, T, H*D) -> (B, T, H*D)  (already in 'b t (h d)' layout)."""
    b, t, hd = q.shape
    kern = functools.partial(_attn_kernel, scale, heads, dim_head)
    return pl.pallas_call(
        kern,
        out_shape=jax.ShapeDtypeStruct((b, t, hd), jnp.bfloat16),
        grid=(b,),
        in_specs=[
            pl.BlockSpec((1, t, hd), lambda i: (i, 0, 0)),
            pl.BlockSpec((1, t, hd), lambda i: (i, 0, 0)),
            pl.BlockSpec((1, t, hd), lambda i: (i, 0, 0)),
        ],
        out_specs=pl.BlockSpec((1, t, hd), lambda i: (i, 0, 0)),
        compiler_params=pltpu.CompilerParams(dimension_semantics=("parallel",)),
    )(q, k, v)


# ---------------------------------------------------------------------------
# One-time weight preparation (outside the forward pass):
#   * permute the rows of w_qkv so the projection output is already laid out
#     as [q | k | v] with (head, dim_head) fastest -> no 5-D rearrange at runtime
#   * pre-transpose to (in, out) layout and cast to bf16 -> no w.T per forward
# ---------------------------------------------------------------------------
def prepare_weights(w_qkv, w_0, heads, dim_head):
    _dim = heads * dim_head
    # original column layout of to_qvk output is '(d k h)':
    #   c = d*(3*heads) + kk*heads + h
    kk = jnp.arange(3)[:, None, None]
    h = jnp.arange(heads)[None, :, None]
    d = jnp.arange(dim_head)[None, None, :]
    orig_cols = (d * (3 * heads) + kk * heads + h).reshape(-1)  # new order (kk,h,d)
    w_perm = w_qkv[orig_cols]                                    # (3*_dim, dim)

    w_q = w_perm[0 * _dim:1 * _dim].T.astype(jnp.bfloat16)       # (dim, _dim)
    w_k = w_perm[1 * _dim:2 * _dim].T.astype(jnp.bfloat16)
    w_v = w_perm[2 * _dim:3 * _dim].T.astype(jnp.bfloat16)
    w0_t = w_0.T.astype(jnp.bfloat16)                            # (_dim, dim)
    return w_q, w_k, w_v, w0_t


# ---------------------------------------------------------------------------
# Full forward pass (mask=None path).
# ---------------------------------------------------------------------------
def multi_head_self_attention(x, w_q, w_k, w_v, w0_t, heads, dim_head):
    b, t, dim = x.shape
    _dim = heads * dim_head
    scale = dim_head ** (-0.5)

    x2d = x.reshape(b * t, dim).astype(jnp.bfloat16)
    q = pallas_linear(x2d, w_q).reshape(b, t, _dim)
    k = pallas_linear(x2d, w_k).reshape(b, t, _dim)
    v = pallas_linear(x2d, w_v).reshape(b, t, _dim)

    attn = pallas_attention(q, k, v, scale, heads, dim_head)    # (b, t, _dim)

    out = pallas_linear(attn.reshape(b * t, _dim), w0_t, out_dtype=jnp.float32)
    return out.reshape(b, t, dim)


mhsa = jax.jit(multi_head_self_attention, static_argnums=(5, 6))


# ---------------------------------------------------------------------------
# Pure-JAX f32 reference (mirrors the PyTorch code).
# ---------------------------------------------------------------------------
def _reference(x, w_qkv, w_0, heads, dim_head):
    b, t, dim = x.shape
    _dim = heads * dim_head
    scale = dim_head ** (-0.5)
    qkv = jnp.einsum("btc,oc->bto", x, w_qkv)
    qkv = qkv.reshape(b, t, dim_head, 3, heads)
    qkv = jnp.transpose(qkv, (3, 0, 4, 1, 2))
    q, k, v = qkv[0], qkv[1], qkv[2]
    s = jnp.einsum("bhid,bhjd->bhij", q, k) * scale
    a = jax.nn.softmax(s, axis=-1)
    out = jnp.einsum("bhij,bhjd->bhid", a, v)
    out = jnp.transpose(out, (0, 2, 1, 3)).reshape(b, t, _dim)
    return jnp.einsum("bto,co->btc", out, w_0)


if __name__ == "__main__":
    # Small shapes consistent with the module: dim=32, heads=4 -> dim_head=8.
    batch, tokens, dim, heads = 2, 16, 32, 4
    dim_head = dim // heads            # default path in __init__ (dim_head=None)
    _dim = dim_head * heads

    key = jax.random.PRNGKey(0)
    kx, kq, kw = jax.random.split(key, 3)

    x = jax.random.normal(kx, (batch, tokens, dim), dtype=jnp.float32)
    # Deterministic synthetic weights, torch Linear layout (out_features, in_features).
    w_qkv = jax.random.normal(kq, (_dim * 3, dim), dtype=jnp.float32) * 0.05
    w_0 = jax.random.normal(kw, (dim, _dim), dtype=jnp.float32) * 0.05

    w_q, w_k, w_v, w0_t = prepare_weights(w_qkv, w_0, heads, dim_head)

    out = mhsa(x, w_q, w_k, w_v, w0_t, heads, dim_head)
    out = jax.block_until_ready(out)

    ref = _reference(x, w_qkv, w_0, heads, dim_head)
    assert out.shape == (batch, tokens, dim)
    max_err = float(jnp.max(jnp.abs(out - ref)))
    # bf16 operands (f32 accumulation) -> loosened tolerance vs. f32 reference.
    assert jnp.allclose(out, ref, atol=2e-2, rtol=2e-2), f"mismatch vs reference: {max_err}"

    print("KERNEL_OK")
</pallas_src>

<mosaic_0001>
module attributes {stable_mosaic.version = 11 : i64} {
  func.func @_attn_kernel(%arg0: i32, %arg1: memref<1x16x32xbf16, #tpu.memory_space<vmem>>, %arg2: memref<1x16x32xbf16, #tpu.memory_space<vmem>>, %arg3: memref<1x16x32xbf16, #tpu.memory_space<vmem>>, %arg4: memref<1x16x32xbf16, #tpu.memory_space<vmem>>) attributes {dimension_semantics = [#tpu.dimension_semantics<parallel>], iteration_bounds = array<i64: 2>, scalar_prefetch = 0 : i64, scratch_operands = 0 : i64, tpu.core_type = #tpu.core_type<tc>, window_params = [{transform_indices = @transform_0, window_bounds = array<i64: 1, 16, 32>}, {transform_indices = @transform_1, window_bounds = array<i64: 1, 16, 32>}, {transform_indices = @transform_2, window_bounds = array<i64: 1, 16, 32>}, {transform_indices = @transform_3, window_bounds = array<i64: 1, 16, 32>}]} {
    %c0 = arith.constant 0 : index
    %c0_0 = arith.constant 0 : index
    %c0_1 = arith.constant 0 : index
    %0 = vector.load %arg1[%c0, %c0_0, %c0_1] : memref<1x16x32xbf16, #tpu.memory_space<vmem>>, vector<1x16x32xbf16>
    %1 = vector.shape_cast %0 : vector<1x16x32xbf16> to vector<16x32xbf16>
    %c0_2 = arith.constant 0 : index
    %c0_3 = arith.constant 0 : index
    %c0_4 = arith.constant 0 : index
    %2 = vector.load %arg2[%c0_2, %c0_3, %c0_4] : memref<1x16x32xbf16, #tpu.memory_space<vmem>>, vector<1x16x32xbf16>
    %3 = vector.shape_cast %2 : vector<1x16x32xbf16> to vector<16x32xbf16>
    %c0_5 = arith.constant 0 : index
    %c0_6 = arith.constant 0 : index
    %c0_7 = arith.constant 0 : index
    %4 = vector.load %arg3[%c0_5, %c0_6, %c0_7] : memref<1x16x32xbf16, #tpu.memory_space<vmem>>, vector<1x16x32xbf16>
    %5 = vector.shape_cast %4 : vector<1x16x32xbf16> to vector<16x32xbf16>
    %6 = vector.extract_strided_slice %1 {offsets = [0, 0], sizes = [16, 8], strides = [1, 1]} : vector<16x32xbf16> to vector<16x8xbf16>
    %7 = vector.extract_strided_slice %3 {offsets = [0, 0], sizes = [16, 8], strides = [1, 1]} : vector<16x32xbf16> to vector<16x8xbf16>
    %8 = vector.extract_strided_slice %5 {offsets = [0, 0], sizes = [16, 8], strides = [1, 1]} : vector<16x32xbf16> to vector<16x8xbf16>
    %cst = arith.constant dense<0.000000e+00> : vector<16x16xf32>
    %9 = tpu.matmul %6, %7, %cst {dimension_numbers = #tpu.dot_dimension_numbers<[1], [1], [0], [0], [0, 0, 1, 0], [], []>} : vector<16x8xbf16>, vector<16x8xbf16>, vector<16x16xf32> -> vector<16x16xf32>
    %cst_8 = arith.constant 0.353553385 : f32
    %10 = vector.broadcast %cst_8 : f32 to vector<16x16xf32>
    %11 = arith.mulf %9, %10 : vector<16x16xf32>
    %cst_9 = arith.constant dense<0xFF800000> : vector<16xf32>
    %12 = vector.multi_reduction <maximumf>, %11, %cst_9 [1] : vector<16x16xf32> to vector<16xf32>
    %13 = vector.shape_cast %12 : vector<16xf32> to vector<16x1xf32>
    %14 = vector.broadcast %13 : vector<16x1xf32> to vector<16x16xf32>
    %15 = arith.subf %11, %14 : vector<16x16xf32>
    %16 = math.exp %15 : vector<16x16xf32>
    %cst_10 = arith.constant dense<0.000000e+00> : vector<16xf32>
    %17 = vector.multi_reduction <add>, %16, %cst_10 [1] : vector<16x16xf32> to vector<16xf32>
    %18 = vector.shape_cast %17 : vector<16xf32> to vector<16x1xf32>
    %19 = tpu.reciprocal %18 {approx = true} : vector<16x1xf32> -> vector<16x1xf32>
    %20 = vector.broadcast %19 : vector<16x1xf32> to vector<16x16xf32>
    %21 = arith.mulf %16, %20 : vector<16x16xf32>
    %22 = arith.truncf %21 : vector<16x16xf32> to vector<16x16xbf16>
    %cst_11 = arith.constant dense<0.000000e+00> : vector<16x8xf32>
    %23 = tpu.matmul %22, %8, %cst_11 {dimension_numbers = #tpu.dot_dimension_numbers<[1], [0], [0], [1], [0, 0, 1, 1], [], []>} : vector<16x16xbf16>, vector<16x8xbf16>, vector<16x8xf32> -> vector<16x8xf32>
    %24 = arith.truncf %23 : vector<16x8xf32> to vector<16x8xbf16>
    %c0_12 = arith.constant 0 : index
    %c0_13 = arith.constant 0 : index
    %c0_14 = arith.constant 0 : index
    %25 = vector.load %arg4[%c0_12, %c0_13, %c0_14] : memref<1x16x32xbf16, #tpu.memory_space<vmem>>, vector<1x16x8xbf16>
    %26 = vector.shape_cast %25 : vector<1x16x8xbf16> to vector<16x8xbf16>
    %27 = vector.shape_cast %24 : vector<16x8xbf16> to vector<1x16x8xbf16>
    tpu.vector_store %arg4[%c0_12, %c0_13, %c0_14], %27 {strides = array<i32>} : memref<1x16x32xbf16, #tpu.memory_space<vmem>>, vector<1x16x8xbf16>,
    %28 = vector.extract_strided_slice %1 {offsets = [0, 8], sizes = [16, 8], strides = [1, 1]} : vector<16x32xbf16> to vector<16x8xbf16>
    %29 = vector.extract_strided_slice %3 {offsets = [0, 8], sizes = [16, 8], strides = [1, 1]} : vector<16x32xbf16> to vector<16x8xbf16>
    %30 = vector.extract_strided_slice %5 {offsets = [0, 8], sizes = [16, 8], strides = [1, 1]} : vector<16x32xbf16> to vector<16x8xbf16>
    %cst_15 = arith.constant dense<0.000000e+00> : vector<16x16xf32>
    %31 = tpu.matmul %28, %29, %cst_15 {dimension_numbers = #tpu.dot_dimension_numbers<[1], [1], [0], [0], [0, 0, 1, 0], [], []>} : vector<16x8xbf16>, vector<16x8xbf16>, vector<16x16xf32> -> vector<16x16xf32>
    %cst_16 = arith.constant 0.353553385 : f32
    %32 = vector.broadcast %cst_16 : f32 to vector<16x16xf32>
    %33 = arith.mulf %31, %32 : vector<16x16xf32>
    %cst_17 = arith.constant dense<0xFF800000> : vector<16xf32>
    %34 = vector.multi_reduction <maximumf>, %33, %cst_17 [1] : vector<16x16xf32> to vector<16xf32>
    %35 = vector.shape_cast %34 : vector<16xf32> to vector<16x1xf32>
    %36 = vector.broadcast %35 : vector<16x1xf32> to vector<16x16xf32>
    %37 = arith.subf %33, %36 : vector<16x16xf32>
    %38 = math.exp %37 : vector<16x16xf32>
    %cst_18 = arith.constant dense<0.000000e+00> : vector<16xf32>
    %39 = vector.multi_reduction <add>, %38, %cst_18 [1] : vector<16x16xf32> to vector<16xf32>
    %40 = vector.shape_cast %39 : vector<16xf32> to vector<16x1xf32>
    %41 = tpu.reciprocal %40 {approx = true} : vector<16x1xf32> -> vector<16x1xf32>
    %42 = vector.broadcast %41 : vector<16x1xf32> to vector<16x16xf32>
    %43 = arith.mulf %38, %42 : vector<16x16xf32>
    %44 = arith.truncf %43 : vector<16x16xf32> to vector<16x16xbf16>
    %cst_19 = arith.constant dense<0.000000e+00> : vector<16x8xf32>
    %45 = tpu.matmul %44, %30, %cst_19 {dimension_numbers = #tpu.dot_dimension_numbers<[1], [0], [0], [1], [0, 0, 1, 1], [], []>} : vector<16x16xbf16>, vector<16x8xbf16>, vector<16x8xf32> -> vector<16x8xf32>
    %46 = arith.truncf %45 : vector<16x8xf32> to vector<16x8xbf16>
    %c0_20 = arith.constant 0 : index
    %c0_21 = arith.constant 0 : index
    %c8 = arith.constant 8 : index
    %47 = vector.load %arg4[%c0_20, %c0_21, %c8] : memref<1x16x32xbf16, #tpu.memory_space<vmem>>, vector<1x16x8xbf16>
    %48 = vector.shape_cast %47 : vector<1x16x8xbf16> to vector<16x8xbf16>
    %49 = vector.shape_cast %46 : vector<16x8xbf16> to vector<1x16x8xbf16>
    tpu.vector_store %arg4[%c0_20, %c0_21, %c8], %49 {strides = array<i32>} : memref<1x16x32xbf16, #tpu.memory_space<vmem>>, vector<1x16x8xbf16>,
    %50 = vector.extract_strided_slice %1 {offsets = [0, 16], sizes = [16, 8], strides = [1, 1]} : vector<16x32xbf16> to vector<16x8xbf16>
    %51 = vector.extract_strided_slice %3 {offsets = [0, 16], sizes = [16, 8], strides = [1, 1]} : vector<16x32xbf16> to vector<16x8xbf16>
    %52 = vector.extract_strided_slice %5 {offsets = [0, 16], sizes = [16, 8], strides = [1, 1]} : vector<16x32xbf16> to vector<16x8xbf16>
    %cst_22 = arith.constant dense<0.000000e+00> : vector<16x16xf32>
    %53 = tpu.matmul %50, %51, %cst_22 {dimension_numbers = #tpu.dot_dimension_numbers<[1], [1], [0], [0], [0, 0, 1, 0], [], []>} : vector<16x8xbf16>, vector<16x8xbf16>, vector<16x16xf32> -> vector<16x16xf32>
    %cst_23 = arith.constant 0.353553385 : f32
    %54 = vector.broadcast %cst_23 : f32 to vector<16x16xf32>
    %55 = arith.mulf %53, %54 : vector<16x16xf32>
    %cst_24 = arith.constant dense<0xFF800000> : vector<16xf32>
    %56 = vector.multi_reduction <maximumf>, %55, %cst_24 [1] : vector<16x16xf32> to vector<16xf32>
    %57 = vector.shape_cast %56 : vector<16xf32> to vector<16x1xf32>
    %58 = vector.broadcast %57 : vector<16x1xf32> to vector<16x16xf32>
    %59 = arith.subf %55, %58 : vector<16x16xf32>
    %60 = math.exp %59 : vector<16x16xf32>
    %cst_25 = arith.constant dense<0.000000e+00> : vector<16xf32>
    %61 = vector.multi_reduction <add>, %60, %cst_25 [1] : vector<16x16xf32> to vector<16xf32>
    %62 = vector.shape_cast %61 : vector<16xf32> to vector<16x1xf32>
    %63 = tpu.reciprocal %62 {approx = true} : vector<16x1xf32> -> vector<16x1xf32>
    %64 = vector.broadcast %63 : vector<16x1xf32> to vector<16x16xf32>
    %65 = arith.mulf %60, %64 : vector<16x16xf32>
    %66 = arith.truncf %65 : vector<16x16xf32> to vector<16x16xbf16>
    %cst_26 = arith.constant dense<0.000000e+00> : vector<16x8xf32>
    %67 = tpu.matmul %66, %52, %cst_26 {dimension_numbers = #tpu.dot_dimension_numbers<[1], [0], [0], [1], [0, 0, 1, 1], [], []>} : vector<16x16xbf16>, vector<16x8xbf16>, vector<16x8xf32> -> vector<16x8xf32>
    %68 = arith.truncf %67 : vector<16x8xf32> to vector<16x8xbf16>
    %c0_27 = arith.constant 0 : index
    %c0_28 = arith.constant 0 : index
    %c16 = arith.constant 16 : index
    %69 = vector.load %arg4[%c0_27, %c0_28, %c16] : memref<1x16x32xbf16, #tpu.memory_space<vmem>>, vector<1x16x8xbf16>
    %70 = vector.shape_cast %69 : vector<1x16x8xbf16> to vector<16x8xbf16>
    %71 = vector.shape_cast %68 : vector<16x8xbf16> to vector<1x16x8xbf16>
    tpu.vector_store %arg4[%c0_27, %c0_28, %c16], %71 {strides = array<i32>} : memref<1x16x32xbf16, #tpu.memory_space<vmem>>, vector<1x16x8xbf16>,
    %72 = vector.extract_strided_slice %1 {offsets = [0, 24], sizes = [16, 8], strides = [1, 1]} : vector<16x32xbf16> to vector<16x8xbf16>
    %73 = vector.extract_strided_slice %3 {offsets = [0, 24], sizes = [16, 8], strides = [1, 1]} : vector<16x32xbf16> to vector<16x8xbf16>
    %74 = vector.extract_strided_slice %5 {offsets = [0, 24], sizes = [16, 8], strides = [1, 1]} : vector<16x32xbf16> to vector<16x8xbf16>
    %cst_29 = arith.constant dense<0.000000e+00> : vector<16x16xf32>
    %75 = tpu.matmul %72, %73, %cst_29 {dimension_numbers = #tpu.dot_dimension_numbers<[1], [1], [0], [0], [0, 0, 1, 0], [], []>} : vector<16x8xbf16>, vector<16x8xbf16>, vector<16x16xf32> -> vector<16x16xf32>
    %cst_30 = arith.constant 0.353553385 : f32
    %76 = vector.broadcast %cst_30 : f32 to vector<16x16xf32>
    %77 = arith.mulf %75, %76 : vector<16x16xf32>
    %cst_31 = arith.constant dense<0xFF800000> : vector<16xf32>
    %78 = vector.multi_reduction <maximumf>, %77, %cst_31 [1] : vector<16x16xf32> to vector<16xf32>
    %79 = vector.shape_cast %78 : vector<16xf32> to vector<16x1xf32>
    %80 = vector.broadcast %79 : vector<16x1xf32> to vector<16x16xf32>
    %81 = arith.subf %77, %80 : vector<16x16xf32>
    %82 = math.exp %81 : vector<16x16xf32>
    %cst_32 = arith.constant dense<0.000000e+00> : vector<16xf32>
    %83 = vector.multi_reduction <add>, %82, %cst_32 [1] : vector<16x16xf32> to vector<16xf32>
    %84 = vector.shape_cast %83 : vector<16xf32> to vector<16x1xf32>
    %85 = tpu.reciprocal %84 {approx = true} : vector<16x1xf32> -> vector<16x1xf32>
    %86 = vector.broadcast %85 : vector<16x1xf32> to vector<16x16xf32>
    %87 = arith.mulf %82, %86 : vector<16x16xf32>
    %88 = arith.truncf %87 : vector<16x16xf32> to vector<16x16xbf16>
    %cst_33 = arith.constant dense<0.000000e+00> : vector<16x8xf32>
    %89 = tpu.matmul %88, %74, %cst_33 {dimension_numbers = #tpu.dot_dimension_numbers<[1], [0], [0], [1], [0, 0, 1, 1], [], []>} : vector<16x16xbf16>, vector<16x8xbf16>, vector<16x8xf32> -> vector<16x8xf32>
    %90 = arith.truncf %89 : vector<16x8xf32> to vector<16x8xbf16>
    %c0_34 = arith.constant 0 : index
    %c0_35 = arith.constant 0 : index
    %c24 = arith.constant 24 : index
    %91 = vector.load %arg4[%c0_34, %c0_35, %c24] : memref<1x16x32xbf16, #tpu.memory_space<vmem>>, vector<1x16x8xbf16>
    %92 = vector.shape_cast %91 : vector<1x16x8xbf16> to vector<16x8xbf16>
    %93 = vector.shape_cast %90 : vector<16x8xbf16> to vector<1x16x8xbf16>
    tpu.vector_store %arg4[%c0_34, %c0_35, %c24], %93 {strides = array<i32>} : memref<1x16x32xbf16, #tpu.memory_space<vmem>>, vector<1x16x8xbf16>,
    return
  }
  func.func @transform_0(%arg0: i32) -> (i32, i32, i32) {
    %c0_i32 = arith.constant 0 : i32
    %c0_i32_0 = arith.constant 0 : i32
    %c0_i32_1 = arith.constant 0 : i32
    return %arg0, %c0_i32, %c0_i32_0 : i32, i32, i32
  }
  func.func @transform_1(%arg0: i32) -> (i32, i32, i32) {
    %c0_i32 = arith.constant 0 : i32
    %c0_i32_0 = arith.constant 0 : i32
    %c0_i32_1 = arith.constant 0 : i32
    return %arg0, %c0_i32, %c0_i32_0 : i32, i32, i32
  }
  func.func @transform_2(%arg0: i32) -> (i32, i32, i32) {
    %c0_i32 = arith.constant 0 : i32
    %c0_i32_0 = arith.constant 0 : i32
    %c0_i32_1 = arith.constant 0 : i32
    return %arg0, %c0_i32, %c0_i32_0 : i32, i32, i32
  }
  func.func @transform_3(%arg0: i32) -> (i32, i32, i32) {
    %c0_i32 = arith.constant 0 : i32
    %c0_i32_0 = arith.constant 0 : i32
    %c0_i32_1 = arith.constant 0 : i32
    return %arg0, %c0_i32, %c0_i32_0 : i32, i32, i32
  }
}

module attributes {stable_mosaic.version = 11 : i64} {
  func.func @_matmul_kernel(%arg0: i32, %arg1: i32, %arg2: i32, %arg3: memref<32x128xbf16, #tpu.memory_space<vmem>>, %arg4: memref<128x128xbf16, #tpu.memory_space<vmem>>, %arg5: memref<32x128xbf16, #tpu.memory_space<vmem>>, %arg6: memref<32x128xf32, #tpu.memory_space<vmem>>) attributes {dimension_semantics = [#tpu.dimension_semantics<parallel>, #tpu.dimension_semantics<parallel>, #tpu.dimension_semantics<arbitrary>], iteration_bounds = array<i64: 1, 1, 1>, scalar_prefetch = 0 : i64, scratch_operands = 1 : i64, tpu.core_type = #tpu.core_type<tc>, window_params = [{transform_indices = @transform_0, window_bounds = array<i64: 32, 128>}, {transform_indices = @transform_1, window_bounds = array<i64: 128, 128>}, {transform_indices = @transform_2, window_bounds = array<i64: 32, 128>}]} {
    %c0_i32 = arith.constant 0 : i32
    %0 = arith.cmpi eq, %arg2, %c0_i32 : i32
    %1 = arith.extui %0 : i1 to i32
    %c0_i32_0 = arith.constant 0 : i32
    %2 = arith.cmpi ne, %1, %c0_i32_0 : i32
    scf.if %2 {
      %cst_10 = arith.constant 0.000000e+00 : f32
      %12 = vector.broadcast %cst_10 : f32 to vector<32x128xf32>
      %c0_11 = arith.constant 0 : index
      %c0_12 = arith.constant 0 : index
      %13 = vector.load %arg6[%c0_11, %c0_12] : memref<32x128xf32, #tpu.memory_space<vmem>>, vector<32x128xf32>
      tpu.vector_store %arg6[%c0_11, %c0_12], %12 {strides = array<i32>} : memref<32x128xf32, #tpu.memory_space<vmem>>, vector<32x128xf32>,
    } else {
    }
    %c0 = arith.constant 0 : index
    %c0_1 = arith.constant 0 : index
    %3 = vector.load %arg6[%c0, %c0_1] : memref<32x128xf32, #tpu.memory_space<vmem>>, vector<32x128xf32>
    %c0_2 = arith.constant 0 : index
    %c0_3 = arith.constant 0 : index
    %4 = vector.load %arg3[%c0_2, %c0_3] : memref<32x128xbf16, #tpu.memory_space<vmem>>, vector<32x128xbf16>
    %c0_4 = arith.constant 0 : index
    %c0_5 = arith.constant 0 : index
    %5 = vector.load %arg4[%c0_4, %c0_5] : memref<128x128xbf16, #tpu.memory_space<vmem>>, vector<128x128xbf16>
    %cst = arith.constant dense<0.000000e+00> : vector<32x128xf32>
    %6 = tpu.matmul %4, %5, %cst {dimension_numbers = #tpu.dot_dimension_numbers<[1], [0], [0], [1], [0, 0, 1, 1], [], []>} : vector<32x128xbf16>, vector<128x128xbf16>, vector<32x128xf32> -> vector<32x128xf32>
    %7 = arith.addf %3, %6 : vector<32x128xf32>
    %c0_6 = arith.constant 0 : index
    %c0_7 = arith.constant 0 : index
    %8 = vector.load %arg6[%c0_6, %c0_7] : memref<32x128xf32, #tpu.memory_space<vmem>>, vector<32x128xf32>
    tpu.vector_store %arg6[%c0_6, %c0_7], %7 {strides = array<i32>} : memref<32x128xf32, #tpu.memory_space<vmem>>, vector<32x128xf32>,
    %c0_i32_8 = arith.constant 0 : i32
    %9 = arith.cmpi eq, %arg2, %c0_i32_8 : i32
    %10 = arith.extui %9 : i1 to i32
    %c0_i32_9 = arith.constant 0 : i32
    %11 = arith.cmpi ne, %10, %c0_i32_9 : i32
    scf.if %11 {
      %c0_10 = arith.constant 0 : index
      %c0_11 = arith.constant 0 : index
      %12 = vector.load %arg6[%c0_10, %c0_11] : memref<32x128xf32, #tpu.memory_space<vmem>>, vector<32x128xf32>
      %13 = arith.truncf %12 : vector<32x128xf32> to vector<32x128xbf16>
      %c0_12 = arith.constant 0 : index
      %c0_13 = arith.constant 0 : index
      %14 = vector.load %arg5[%c0_12, %c0_13] : memref<32x128xbf16, #tpu.memory_space<vmem>>, vector<32x128xbf16>
      tpu.vector_store %arg5[%c0_12, %c0_13], %13 {strides = array<i32>} : memref<32x128xbf16, #tpu.memory_space<vmem>>, vector<32x128xbf16>,
    } else {
    }
    return
  }
  func.func @transform_0(%arg0: i32, %arg1: i32, %arg2: i32) -> (i32, i32) {
    %c0_i32 = arith.constant 0 : i32
    return %arg0, %arg2 : i32, i32
  }
  func.func @transform_1(%arg0: i32, %arg1: i32, %arg2: i32) -> (i32, i32) {
    %c0_i32 = arith.constant 0 : i32
    return %arg2, %arg1 : i32, i32
  }
  func.func @transform_2(%arg0: i32, %arg1: i32, %arg2: i32) -> (i32, i32) {
    %c0_i32 = arith.constant 0 : i32
    return %arg0, %arg1 : i32, i32
  }
}

module attributes {stable_mosaic.version = 11 : i64} {
  func.func @_matmul_kernel(%arg0: i32, %arg1: i32, %arg2: i32, %arg3: memref<32x128xbf16, #tpu.memory_space<vmem>>, %arg4: memref<128x128xbf16, #tpu.memory_space<vmem>>, %arg5: memref<32x128xf32, #tpu.memory_space<vmem>>, %arg6: memref<32x128xf32, #tpu.memory_space<vmem>>) attributes {dimension_semantics = [#tpu.dimension_semantics<parallel>, #tpu.dimension_semantics<parallel>, #tpu.dimension_semantics<arbitrary>], iteration_bounds = array<i64: 1, 1, 1>, scalar_prefetch = 0 : i64, scratch_operands = 1 : i64, tpu.core_type = #tpu.core_type<tc>, window_params = [{transform_indices = @transform_0, window_bounds = array<i64: 32, 128>}, {transform_indices = @transform_1, window_bounds = array<i64: 128, 128>}, {transform_indices = @transform_2, window_bounds = array<i64: 32, 128>}]} {
    %c0_i32 = arith.constant 0 : i32
    %0 = arith.cmpi eq, %arg2, %c0_i32 : i32
    %1 = arith.extui %0 : i1 to i32
    %c0_i32_0 = arith.constant 0 : i32
    %2 = arith.cmpi ne, %1, %c0_i32_0 : i32
    scf.if %2 {
      %cst_10 = arith.constant 0.000000e+00 : f32
      %12 = vector.broadcast %cst_10 : f32 to vector<32x128xf32>
      %c0_11 = arith.constant 0 : index
      %c0_12 = arith.constant 0 : index
      %13 = vector.load %arg6[%c0_11, %c0_12] : memref<32x128xf32, #tpu.memory_space<vmem>>, vector<32x128xf32>
      tpu.vector_store %arg6[%c0_11, %c0_12], %12 {strides = array<i32>} : memref<32x128xf32, #tpu.memory_space<vmem>>, vector<32x128xf32>,
    } else {
    }
    %c0 = arith.constant 0 : index
    %c0_1 = arith.constant 0 : index
    %3 = vector.load %arg6[%c0, %c0_1] : memref<32x128xf32, #tpu.memory_space<vmem>>, vector<32x128xf32>
    %c0_2 = arith.constant 0 : index
    %c0_3 = arith.constant 0 : index
    %4 = vector.load %arg3[%c0_2, %c0_3] : memref<32x128xbf16, #tpu.memory_space<vmem>>, vector<32x128xbf16>
    %c0_4 = arith.constant 0 : index
    %c0_5 = arith.constant 0 : index
    %5 = vector.load %arg4[%c0_4, %c0_5] : memref<128x128xbf16, #tpu.memory_space<vmem>>, vector<128x128xbf16>
    %cst = arith.constant dense<0.000000e+00> : vector<32x128xf32>
    %6 = tpu.matmul %4, %5, %cst {dimension_numbers = #tpu.dot_dimension_numbers<[1], [0], [0], [1], [0, 0, 1, 1], [], []>} : vector<32x128xbf16>, vector<128x128xbf16>, vector<32x128xf32> -> vector<32x128xf32>
    %7 = arith.addf %3, %6 : vector<32x128xf32>
    %c0_6 = arith.constant 0 : index
    %c0_7 = arith.constant 0 : index
    %8 = vector.load %arg6[%c0_6, %c0_7] : memref<32x128xf32, #tpu.memory_space<vmem>>, vector<32x128xf32>
    tpu.vector_store %arg6[%c0_6, %c0_7], %7 {strides = array<i32>} : memref<32x128xf32, #tpu.memory_space<vmem>>, vector<32x128xf32>,
    %c0_i32_8 = arith.constant 0 : i32
    %9 = arith.cmpi eq, %arg2, %c0_i32_8 : i32
    %10 = arith.extui %9 : i1 to i32
    %c0_i32_9 = arith.constant 0 : i32
    %11 = arith.cmpi ne, %10, %c0_i32_9 : i32
    scf.if %11 {
      %c0_10 = arith.constant 0 : index
      %c0_11 = arith.constant 0 : index
      %12 = vector.load %arg6[%c0_10, %c0_11] : memref<32x128xf32, #tpu.memory_space<vmem>>, vector<32x128xf32>
      %c0_12 = arith.constant 0 : index
      %c0_13 = arith.constant 0 : index
      %13 = vector.load %arg5[%c0_12, %c0_13] : memref<32x128xf32, #tpu.memory_space<vmem>>, vector<32x128xf32>
      tpu.vector_store %arg5[%c0_12, %c0_13], %12 {strides = array<i32>} : memref<32x128xf32, #tpu.memory_space<vmem>>, vector<32x128xf32>,
    } else {
    }
    return
  }
  func.func @transform_0(%arg0: i32, %arg1: i32, %arg2: i32) -> (i32, i32) {
    %c0_i32 = arith.constant 0 : i32
    return %arg0, %arg2 : i32, i32
  }
  func.func @transform_1(%arg0: i32, %arg1: i32, %arg2: i32) -> (i32, i32) {
    %c0_i32 = arith.constant 0 : i32
    return %arg2, %arg1 : i32, i32
  }
  func.func @transform_2(%arg0: i32, %arg1: i32, %arg2: i32) -> (i32, i32) {
    %c0_i32 = arith.constant 0 : i32
    return %arg0, %arg1 : i32, i32
  }
}

</mosaic_0001>

<bundles_post_ra>
// kernel: multi_head_self_attention.5
= control target key start
LH: loop header
LB: loop body
LE: loop exit
PB: predicated region body
PF: predicated region fallthrough
CT: control target
= control target key end

     0   :  { %s269_s1 = inlined_call_operand.vmem [shape: bf16[128,128], index: 1, kind: input, shape index: {}]   ;;  %s270_s0 = inlined_call_operand.vmem [shape: bf16[32,128], index: 0, kind: input, shape index: {}]   ;;  %s271_s2 = inlined_call_operand.vmem [shape: bf16[32,128], index: 2, kind: output, shape index: {}]  }
   0x1   :  { %v198_v0 = vld [vmem:[%s269_s1 + $0x38] sm:$0xff]  ;;  %v197_v1 = vld [vmem:[%s269_s1 + $0x30] sm:$0xff]  ;;  %v196_v2 = vld [vmem:[%s269_s1 + $0x28] sm:$0xff] }
   0x2   :  { %103 = vmatpush.bf16.msra.mxu0 %v198_v0  ;;  %210 = vmatpush.bf16.msra.mxu1 %v198_v0  ;;  %v195_v3 = vld [vmem:[%s269_s1 + $0x20] sm:$0xff]  ;;  %v194_v4 = vld [vmem:[%s269_s1 + $0x18] sm:$0xff]  ;;  %v193_v5 = vld [vmem:[%s269_s1 + $0x10] sm:$0xff] }
   0x3   :  { %v192_v6 = vld [vmem:[%s269_s1 + $0x8] sm:$0xff]  ;;  %v191_v7 = vld [vmem:[%s269_s1] sm:$0xff] }
   0x4   :  { %v189_v8 = vld [vmem:[%s270_s0] sm:$0xff]  ;;  %v190_v9 = vld [vmem:[%s270_s0 + $0x8] sm:$0xff] }
   0x6   :  { %104 = vmatpush.bf16.msra.mxu0 %v197_v1  ;;  %211 = vmatpush.bf16.msra.mxu1 %v197_v1 }
   0xa   :  { %105 = vmatpush.bf16.msra.mxu0 %v196_v2  ;;  %212 = vmatpush.bf16.msra.mxu1 %v196_v2 }
   0xe   :  { %106 = vmatpush.bf16.msra.mxu0 %v195_v3  ;;  %213 = vmatpush.bf16.msra.mxu1 %v195_v3 }
  0x12   :  { %107 = vmatpush.bf16.msra.mxu0 %v194_v4  ;;  %214 = vmatpush.bf16.msra.mxu1 %v194_v4 }
  0x16   :  { %108 = vmatpush.bf16.msra.mxu0 %v193_v5  ;;  %215 = vmatpush.bf16.msra.mxu1 %v193_v5 }
  0x1a   :  { %109 = vmatpush.bf16.msra.mxu0 %v192_v6  ;;  %216 = vmatpush.bf16.msra.mxu1 %v192_v6 }
  0x1e   :  { %110 = vmatpush.bf16.msra.mxu0 %v191_v7  ;;  %217 = vmatpush.bf16.msra.mxu1 %v191_v7 }
  0x21   :  { %111 = vmatmul.bf16.vlgmr.msra.gmra.mxu0 %v189_v8  ;;  %116 = vmatmul.bf16.vlgmr.msra.gmra.mxu1 %v190_v9 }
  0x9e   :  { %v112_v10 = vpop.f32.mrf.mxu0  ;;  %v117_v11 = vpop.f32.mrf.mxu1 }
  0xa6   :  { %v114_v12 = vpop.f32.mrf.mxu0  ;;  %v119_v13 = vpop.f32.mrf.mxu1 }
  0xa7   :  { %v202_v14 = vpack.c.bf16 %v114_v12, %v112_v10  ;;  %v207_v15 = vpack.c.bf16 %v119_v13, %v117_v11 }
  0xa9   :  { %203 = vst [vmem:[%s271_s2] sm:$0xff] %v202_v14  }
  0xaa   :  { %209 = vst [vmem:[%s271_s2 + $0x8] sm:$0xff] %v207_v15  }

// kernel: multi_head_self_attention.9
= control target key start
LH: loop header
LB: loop body
LE: loop exit
PB: predicated region body
PF: predicated region fallthrough
CT: control target
= control target key end

     0   :  { %s298_s0 = inlined_call_operand.vmem [shape: bf16[32,128], index: 0, kind: input, shape index: {}]   ;;  %s299_s1 = inlined_call_operand.vmem [shape: bf16[128,128], index: 1, kind: input, shape index: {}]   ;;  %s300_s2 = inlined_call_operand.hbm [shape: f32[32,128], index: 2, kind: output, shape index: {}]  }
   0x1   :  { %v209_v0 = vld [vmem:[%s299_s1 + $0x38] sm:$0xff]  ;;  %v208_v1 = vld [vmem:[%s299_s1 + $0x30] sm:$0xff] }
   0x2   :  { %104 = vmatpush.bf16.msra.mxu0 %v209_v0  ;;  %210 = vmatpush.bf16.msra.mxu1 %v209_v0 }
   0x3   :  { %7 = vsyncpa [#allocation4], 0  ;;  %v207_v2 = vld [vmem:[%s299_s1 + $0x28] sm:$0xff]  ;;  %v206_v3 = vld [vmem:[%s299_s1 + $0x20] sm:$0xff]  ;;  %s247_s29 = smov [#allocation3]   ;;  %s148_s4 = sshll.u32 %s300_s2, 4  ;;  %s149_s4 = int_to_ptr.hbm [resolvable:$true] %s148_s4 }
   0x4   :  { %v205_v4 = vld [vmem:[%s299_s1 + $0x18] sm:$0xff]  ;;  %v204_v5 = vld [vmem:[%s299_s1 + $0x10] sm:$0xff]  ;;  %v203_v6 = vld [vmem:[%s299_s1 + $0x8] sm:$0xff]  ;;  %s146_s30 = sshll.u32 %s247_s29, 4  ;;  %s249_s5 = smov 8   ;;  %s147_s30 = int_to_ptr.vmem [resolvable:$true] %s146_s30 }
   0x5   :  { %v202_v7 = vld [vmem:[%s299_s1] sm:$0xff]  ;;  %v201_v9 = vld [vmem:[%s298_s0 + $0x8] sm:$0xff] }
   0x6   :  { %105 = vmatpush.bf16.msra.mxu0 %v208_v1  ;;  %211 = vmatpush.bf16.msra.mxu1 %v208_v1  ;;  %v200_v8 = vld [vmem:[%s298_s0] sm:$0xff]  ;;  %s248_s0 = smov 128  }
   0xa   :  { %106 = vmatpush.bf16.msra.mxu0 %v207_v2  ;;  %212 = vmatpush.bf16.msra.mxu1 %v207_v2 }
   0xe   :  { %107 = vmatpush.bf16.msra.mxu0 %v206_v3  ;;  %213 = vmatpush.bf16.msra.mxu1 %v206_v3 }
  0x12   :  { %108 = vmatpush.bf16.msra.mxu0 %v205_v4  ;;  %214 = vmatpush.bf16.msra.mxu1 %v205_v4 }
  0x16   :  { %109 = vmatpush.bf16.msra.mxu0 %v204_v5  ;;  %215 = vmatpush.bf16.msra.mxu1 %v204_v5 }
  0x1a   :  { %110 = vmatpush.bf16.msra.mxu0 %v203_v6  ;;  %216 = vmatpush.bf16.msra.mxu1 %v203_v6 }
  0x1e   :  { %111 = vmatpush.bf16.msra.mxu0 %v202_v7  ;;  %217 = vmatpush.bf16.msra.mxu1 %v202_v7 }
  0x21   :  { %112 = vmatmul.bf16.vlgmr.msra.gmra.mxu0 %v200_v8  ;;  %117 = vmatmul.bf16.vlgmr.msra.gmra.mxu1 %v201_v9 }
  0x9e   :  { %v113_v10 = vpop.f32.mrf.mxu0  ;;  %v118_v11 = vpop.f32.mrf.mxu1 }
  0x9f   :  { %138 = vst [vmem:[#allocation3] sm:$0xff] %v113_v10 }
  0xa0   :  { %140 = vst [vmem:[#allocation3 + $0x10] sm:$0xff] %v118_v11 }
  0xa6   :  { %v115_v12 = vpop.f32.mrf.mxu0  ;;  %v120_v13 = vpop.f32.mrf.mxu1 }
  0xa7   :  { %139 = vst [vmem:[#allocation3 + $0x8] sm:$0xff] %v115_v12 }
  0xa8   :  { %141 = vst [vmem:[#allocation3 + $0x18] sm:$0xff] %v120_v13 }
  0xa9   :  { %154 = dma.vmem_to_hbm [thread:$0]  %s147_s30, 512, %s149_s4, [#allocation4], %s248_s0, %s248_s0, %s249_s5  }
  0xaa   :  { %245 = dma.done.wait [#allocation4], 512  }
  0xab   :  { %246 = vsyncadd [#allocation4], 4294966784 }
  0xac   :  { %159 = vsyncpa [#allocation4], 1 }

// kernel: multi_head_self_attention.8
= control target key start
LH: loop header
LB: loop body
LE: loop exit
PB: predicated region body
PF: predicated region fallthrough
CT: control target
= control target key end

     0   :  { %s750_s12 = smov 0   ;;  %s836_s0 = inlined_call_operand.vmem [shape: bf16[2,16,32], index: 0, kind: input, shape index: {}]   ;;  %s837_s1 = inlined_call_operand.vmem [shape: bf16[2,16,32], index: 1, kind: input, shape index: {}]   ;;  %s838_s2 = inlined_call_operand.vmem [shape: bf16[2,16,32], index: 2, kind: input, shape index: {}]   ;;  %s839_s3 = inlined_call_operand.vmem [shape: bf16[2,16,32], index: 3, kind: output, shape index: {}]  }
   0x1 LB: > { %s628_s13 = sadd.s32 4294967295, %s722_s12   ;;  %p632_p0 = scmp.ge.s32.totalorder %s722_s12, 1  ;;  %s722_s12 = sphi %s750_s12, %s13_s12  }
   0x2   : > { %p157_p1 = scmp.lt.s32.totalorder %s722_s12, 3 }
   0x4   : > { %p158_p2 = pnand %p632_p0, %p157_p1 }
   0x5   : > { %p191_p3 = scmp.lt.s32.totalorder (!%p158_p2), %s628_s13, 1  ;;  %s724_s21 = smov (!%p158_p2), 120  }
   0x6   : > { %161 = sbr.rel (%p158_p2) target bundleno = 1090 (0x442), region = 32  ;;  %s725_s22 = smov (!%p158_p2), 104  }
   0x7   : > { %s726_s23 = smov (!%p158_p2), 112   ;;  %s727_s30 = smov (!%p158_p2), 8  }
   0x8   : > { %s728_s4 = smov (!%p158_p2), 16   ;;  %s729_s5 = smov (!%p158_p2), 24  }
   0xb   : > { %s841_s13 = smov (!%p191_p3, %s628_s13), 1  ;;  %vm228_vm0 = vcmask 64512   ;;  %vm251_vm1 = vcmask 130048   ;;  %vm300_vm2 = vcmask 60416   ;;  %vm382_vm3 = vcmask 126016  }
   0xc   : > { %s758_s14 = sshll.u32 %s841_s13, 3  ;;  %vm464_vm4 = vcmask 191616   ;;  %vm546_vm5 = vcmask 257216  }
   0xd   : > { %s200_s17 = scalar_lea.vmem %s837_s1, %s758_s14  ;;  %s195_s20 = scalar_lea.vmem %s836_s0, %s758_s14 }
   0xe   : > { %v668_v0 = vld [vmem:[%s200_s17] sm:$0xff]  ;;  %s205_s26 = scalar_lea.vmem %s838_s2, %s758_s14  ;;  %s806_s29 = scalar_lea.vmem %s839_s3, %s758_s14 }
   0xf   : > { %v667_v1 = vld [vmem:[%s195_s20] sm:$0xff]  ;;  %v233_v2 = vsel %vm228_vm0, %v668_v0, 0  ;;  %305 = vrot.lane.b32.xlu1 %v668_v0, %s724_s21 }
  0x10   : > { %242 = vmatpush.bf16.xpose.msra.mxu0 %v233_v2  ;;  %303 = vrot.lane.b32.xlu2 %v667_v1, %s724_s21  ;;  %v789_v30 = vld [vmem:[%s205_s26] sm:$0xff] }
  0x11   : > { %291 = vmatpush.bf16.msra.mxu1 %v789_v30 }
  0x17   : > { %649 = vmatmul.msk.bf16.vlgmr.msra.gmra.mxu0 %vm228_vm0, %v667_v1 }
  0x18   : > { %469 = vrot.lane.b32.xlu2 %v668_v0, %s725_s22 }
  0x6a   : > { %v304_v5 = vpop.permute.xlu2 %303 }
  0x72   : > { %v470_v20 = vpop.permute.xlu2 %469 }
  0x73   : > { %v475_v22 = vsel %vm228_vm0, %v470_v20, 0 }
  0x74   : > { %484 = vmatpush.bf16.xpose.msrb.mxu0 %v475_v22 }
  0x81   : > { %v306_v3 = vpop.permute.xlu1 %305 }
  0x82   : > { %v311_v4 = vsel %vm228_vm0, %v306_v3, 0 }
  0x83   : > { %320 = vmatpush.bf16.xpose.msra.mxu2 %v311_v4 }
  0x8a   : > { %655 = vmatmul.msk.bf16.vlgmr.msra.gmra.mxu2 %vm228_vm0, %v304_v5 }
  0x94   : > { %v244_v6 = vpop.f32.mrf.mxu0 }
  0x95   : > { %v249_v7 = vmul.f32 0.35355338, %v244_v6 }
  0x97   : > { %v252_v8 = vsel %vm251_vm1, %v249_v7, -inf }
  0x98   : > { %253 = vmax.xlane.f32.xlu0 %v252_v8 }
  0x9c   : > { %v246_v9 = vpop.f32.mrf.mxu0 }
  0x9d   : > { %v250_v10 = vmul.f32 0.35355338, %v246_v9 }
  0x9f   : > { %v255_v11 = vsel %vm251_vm1, %v250_v10, -inf }
  0xa0   : > { %256 = vmax.xlane.f32.xlu0 %v255_v11 }
  0xb4   : > { %387 = vrot.lane.b32.xlu0 %v668_v0, %s726_s23 }
  0xbc   : > { %385 = vrot.lane.b32.xlu0 %v667_v1, %s726_s23 }
 0x10b   : > { %v254_v12 = vpop.xlane.xlu0 %253 }
 0x10c   : > { %v258_v13 = vsub.f32 %v249_v7, %v254_v12 }
 0x10d   : > { %v322_v21 = vpop.f32.mrf.mxu2 }
 0x10e   : > { %v260_v14 = vmul.f32 1.442695, %v258_v13  ;;  %v327_v23 = vmul.f32 0.35355338, %v322_v21 }
 0x110   : > { %684 = vpow2.f32 %v260_v14  ;;  %v329_v24 = vsel %vm251_vm1, %v327_v23, -inf }
 0x111   : > { %330 = vmax.xlane.f32.xlu0 %v329_v24 }
 0x113   : > { %v257_v15 = vpop.xlane.xlu0 %256 }
 0x114   : > { %v259_v16 = vsub.f32 %v250_v10, %v257_v15 }
 0x115   : > { %v324_v27 = vpop.f32.mrf.mxu2 }
 0x116   : > { %v685_v17 = vpop.eup %684  ;;  %v262_v18 = vmul.f32 1.442695, %v259_v16  ;;  %v328_v28 = vmul.f32 0.35355338, %v324_v27 }
 0x117   : > { %v264_v19 = vsel %vm251_vm1, %v685_v17, 0.0 }
 0x118   : > { %686 = vpow2.f32 %v262_v18  ;;  %265 = vadd.xlane.f32.xlu1 %v264_v19  ;;  %v332_v29 = vsel %vm251_vm1, %v328_v28, -inf }
 0x11e   : > { %v687_v25 = vpop.eup %686 }
 0x11f   : > { %v267_v26 = vsel %vm251_vm1, %v687_v25, 0.0 }
 0x120   : > { %268 = vadd.xlane.f32.xlu2 %v267_v26 }
 0x126   : > { %v388_v31 = vpop.permute.xlu0 %387 }
 0x127   : > { %v393_v32 = vsel %vm228_vm0, %v388_v31, 0 }
 0x128   : > { %402 = vmatpush.bf16.xpose.msrb.mxu1 %v393_v32 }
 0x12e   : > { %v386_v41 = vpop.permute.xlu0 %385 }
 0x138   : > { %467 = vrot.lane.b32.xlu2 %v667_v1, %s725_s22 }
 0x161   : > { %333 = vmax.xlane.f32.xlu2 %v332_v29 }
 0x179   : > { %352 = vrot.lane.b32.xlu2 %v789_v30, %s724_s21 }
 0x184   : > { %v331_v57 = vpop.xlane.xlu0 %330 }
 0x185   : > { %v335_v60 = vsub.f32 %v327_v23, %v331_v57 }
 0x187   : > { %v337_v62 = vmul.f32 1.442695, %v335_v60 }
 0x18b   : > { %v266_v33 = vpop.xlane.xlu1 %265 }
 0x18c   : > { %688 = vrcp.f32 %v266_v33 }
 0x192   : > { %v689_v35 = vpop.eup %688 }
 0x193   : > { %v269_v34 = vpop.xlane.xlu2 %268  ;;  %v272_v38 = vmul.f32 %v689_v35, %v685_v17 }
 0x194   : > { %690 = vrcp.f32 %v269_v34 }
 0x19a   : > { %v691_v36 = vpop.eup %690 }
 0x19b   : > { %v468_v37 = vpop.permute.xlu2 %467  ;;  %v273_v39 = vmul.f32 %v691_v36, %v687_v25 }
 0x19c   : > { %659 = vmatmul.msk.bf16.vlgmr.msrb.gmra.mxu0 %vm228_vm0, %v468_v37 }
 0x19d   : > { %v274_v40 = vpack.c.bf16 %v273_v39, %v272_v38 }
 0x19f   : > { %654 = vmatmul.msk.bf16.vlgmr.msra.gmra.mxu1 %vm251_vm1, %v274_v40 }
 0x1af   : > { %657 = vmatmul.msk.bf16.vlgmr.msrb.gmra.mxu1 %vm228_vm0, %v386_v41 }
 0x1d4   : > { %v334_v42 = vpop.xlane.xlu2 %333 }
 0x1d5   : > { %v336_v43 = vsub.f32 %v328_v28, %v334_v42 }
 0x1d7   : > { %v339_v44 = vmul.f32 1.442695, %v336_v43 }
 0x1d9   : > { %692 = vpow2.f32 %v339_v44 }
 0x1da   : > { %694 = vpow2.f32 %v337_v62 }
 0x1dc   : > { %v353_v8 = vpop.permute.xlu2 %352 }
 0x1dd   : > { %365 = vmatpush.bf16.msra.mxu3 %v353_v8 }
 0x1df   : > { %v798_v45 = vpop.eup %692 }
 0x1e0   : > { %v344_v46 = vsel %vm251_vm1, %v798_v45, 0.0  ;;  %v695_v2 = vpop.eup %694 }
 0x1e1   : > { %345 = vadd.xlane.f32.xlu0 %v344_v46  ;;  %v341_v3 = vsel %vm251_vm1, %v695_v2, 0.0 }
 0x219   : > { %v486_v47 = vpop.f32.mrf.mxu0 }
 0x21a   : > { %v491_v48 = vmul.f32 0.35355338, %v486_v47 }
 0x21c   : > { %v293_v49 = vpop.f32.mrf.mxu1  ;;  %v493_v50 = vsel %vm251_vm1, %v491_v48, -inf }
 0x21d   : > { %v298_v51 = vpack.c.bf16 %v293_v49, %v293_v49  ;;  %494 = vmax.xlane.f32.xlu1 %v493_v50 }
 0x21f   : > { %301 = vst.msk [vmem:[%s806_s29] sm:$0xf] %vm300_vm2, %v298_v51 }
 0x221   : > { %v488_v52 = vpop.f32.mrf.mxu0 }
 0x222   : > { %v492_v53 = vmul.f32 0.35355338, %v488_v52 }
 0x224   : > { %v295_v54 = vpop.f32.mrf.mxu1  ;;  %v496_v55 = vsel %vm251_vm1, %v492_v53, -inf }
 0x225   : > { %v299_v56 = vpack.c.bf16 %v295_v54, %v295_v54  ;;  %497 = vmax.xlane.f32.xlu1 %v496_v55 }
 0x227   : > { %302 = vst.msk [vmem:[%s806_s29 + $0x4] sm:$0xf] %vm300_vm2, %v299_v56 }
 0x22c   : > { %v404_v58 = vpop.f32.mrf.mxu1 }
 0x22d   : > { %v409_v59 = vmul.f32 0.35355338, %v404_v58 }
 0x22f   : > { %v411_v61 = vsel %vm251_vm1, %v409_v59, -inf }
 0x230   : > { %412 = vmax.xlane.f32.xlu1 %v411_v61 }
 0x234   : > { %v406_v63 = vpop.f32.mrf.mxu1 }
 0x235   : > { %v410_v0 = vmul.f32 0.35355338, %v406_v63 }
 0x237   : > { %v414_v1 = vsel %vm251_vm1, %v410_v0, -inf }
 0x238   : > { %415 = vmax.xlane.f32.xlu1 %v414_v1 }
 0x240   : > { %342 = vadd.xlane.f32.xlu1 %v341_v3 }
 0x254   : > { %v346_v22 = vpop.xlane.xlu0 %345 }
 0x290   : > { %v495_v4 = vpop.xlane.xlu1 %494 }
 0x291   : > { %v499_v5 = vsub.f32 %v491_v48, %v495_v4 }
 0x293   : > { %v501_v6 = vmul.f32 1.442695, %v499_v5 }
 0x295   : > { %696 = vpow2.f32 %v501_v6 }
 0x298   : > { %v498_v7 = vpop.xlane.xlu1 %497 }
 0x299   : > { %v500_v9 = vsub.f32 %v492_v53, %v498_v7 }
 0x29b   : > { %v697_v10 = vpop.eup %696  ;;  %v503_v11 = vmul.f32 1.442695, %v500_v9 }
 0x29c   : > { %v505_v12 = vsel %vm251_vm1, %v697_v10, 0.0 }
 0x29d   : > { %698 = vpow2.f32 %v503_v11  ;;  %506 = vadd.xlane.f32.xlu1 %v505_v12 }
 0x2a3   : > { %v699_v13 = vpop.eup %698  ;;  %v413_v14 = vpop.xlane.xlu1 %412 }
 0x2a4   : > { %v417_v15 = vsub.f32 %v409_v59, %v413_v14  ;;  %v508_v16 = vsel %vm251_vm1, %v699_v13, 0.0 }
 0x2a5   : > { %509 = vadd.xlane.f32.xlu0 %v508_v16 }
 0x2a6   : > { %v419_v17 = vmul.f32 1.442695, %v417_v15 }
 0x2a8   : > { %700 = vpow2.f32 %v419_v17 }
 0x2ab   : > { %v416_v18 = vpop.xlane.xlu1 %415 }
 0x2ac   : > { %v418_v19 = vsub.f32 %v410_v0, %v416_v18 }
 0x2ae   : > { %v701_v20 = vpop.eup %700  ;;  %v421_v21 = vmul.f32 1.442695, %v418_v19 }
 0x2af   : > { %v423_v23 = vsel %vm251_vm1, %v701_v20, 0.0 }
 0x2b0   : > { %702 = vpow2.f32 %v421_v21  ;;  %424 = vadd.xlane.f32.xlu1 %v423_v23 }
 0x2b1   : > { %704 = vrcp.f32 %v346_v22 }
 0x2b3   : > { %v343_v24 = vpop.xlane.xlu1 %342 }
 0x2b4   : > { %706 = vrcp.f32 %v343_v24 }
 0x2b6   : > { %v703_v25 = vpop.eup %702 }
 0x2b7   : > { %v426_v26 = vsel %vm251_vm1, %v703_v25, 0.0  ;;  %v705_v27 = vpop.eup %704 }
 0x2b8   : > { %427 = vadd.xlane.f32.xlu0 %v426_v26  ;;  %v350_v31 = vmul.f32 %v705_v27, %v798_v45 }
 0x2ba   : > { %v707_v28 = vpop.eup %706 }
 0x2bb   : > { %v349_v29 = vmul.f32 %v707_v28, %v695_v2 }
 0x2bd   : > { %v351_v32 = vpack.c.bf16 %v350_v31, %v349_v29 }
 0x2bf   : > { %656 = vmatmul.msk.bf16.vlgmr.msra.gmra.mxu3 %vm251_vm1, %v351_v32 }
 0x2c9   : > { %434 = vrot.lane.b32.xlu1 %v789_v30, %s726_s23 }
 0x2cc   : > { %516 = vrot.lane.b32.xlu0 %v789_v30, %s725_s22 }
 0x310   : > { %v507_v34 = vpop.xlane.xlu1 %506 }
 0x318   : > { %v510_v33 = vpop.xlane.xlu0 %509 }
 0x323   : > { %v425_v36 = vpop.xlane.xlu1 %424 }
 0x32b   : > { %v428_v35 = vpop.xlane.xlu0 %427 }
 0x32c   : > { %708 = vrcp.f32 %v428_v35 }
 0x32d   : > { %710 = vrcp.f32 %v425_v36 }
 0x32e   : > { %712 = vrcp.f32 %v510_v33 }
 0x32f   : > { %714 = vrcp.f32 %v507_v34 }
 0x332   : > { %v709_v37 = vpop.eup %708 }
 0x333   : > { %v711_v38 = vpop.eup %710  ;;  %v432_v40 = vmul.f32 %v709_v37, %v703_v25 }
 0x334   : > { %v713_v39 = vpop.eup %712  ;;  %v431_v42 = vmul.f32 %v711_v38, %v701_v20 }
 0x335   : > { %v715_v41 = vpop.eup %714  ;;  %v514_v44 = vmul.f32 %v713_v39, %v699_v13 }
 0x336   : > { %v433_v45 = vpack.c.bf16 %v432_v40, %v431_v42  ;;  %v513_v30 = vmul.f32 %v715_v41, %v697_v10 }
 0x338   : > { %v515_v47 = vpack.c.bf16 %v514_v44, %v513_v30 }
 0x33b   : > { %v435_v43 = vpop.permute.xlu1 %434 }
 0x33c   : > { %447 = vmatpush.bf16.msrb.mxu3 %v435_v43 }
 0x33e   : > { %v517_v46 = vpop.permute.xlu0 %516 }
 0x33f   : > { %658 = vmatmul.msk.bf16.vlgmr.msrb.gmra.mxu3 %vm251_vm1, %v433_v45  ;;  %529 = vmatpush.bf16.msrb.mxu2 %v517_v46 }
 0x342   : > { %v367_v48 = vpop.f32.mrf.mxu3  ;;  %660 = vmatmul.msk.bf16.vlgmr.msrb.gmra.mxu2 %vm251_vm1, %v515_v47 }
 0x343   : > { %v372_v49 = vpack.c.bf16 %v367_v48, %v367_v48 }
 0x345   : > { %376 = vrot.lane.b32.xlu2 %v372_v49, %s727_s30 }
 0x34a   : > { %v369_v50 = vpop.f32.mrf.mxu3 }
 0x34b   : > { %v373_v51 = vpack.c.bf16 %v369_v50, %v369_v50 }
 0x34d   : > { %378 = vrot.lane.b32.xlu2 %v373_v51, %s727_s30 }
 0x39f   : > { %v377_v52 = vpop.permute.xlu2 %376 }
 0x3a0   : > { %383 = vst.msk [vmem:[%s806_s29] sm:$0xf] %vm382_vm3, %v377_v52 }
 0x3a7   : > { %v379_v53 = vpop.permute.xlu2 %378 }
 0x3a8   : > { %384 = vst.msk [vmem:[%s806_s29 + $0x4] sm:$0xf] %vm382_vm3, %v379_v53 }
 0x3c2   : > { %v449_v54 = vpop.f32.mrf.mxu3 }
 0x3c3   : > { %v454_v55 = vpack.c.bf16 %v449_v54, %v449_v54 }
 0x3c5   : > { %458 = vrot.lane.b32.xlu2 %v454_v55, %s728_s4  ;;  %v531_v56 = vpop.f32.mrf.mxu2 }
 0x3c6   : > { %v536_v57 = vpack.c.bf16 %v531_v56, %v531_v56 }
 0x3c8   : > { %540 = vrot.lane.b32.xlu1 %v536_v57, %s729_s5 }
 0x3ca   : > { %v451_v58 = vpop.f32.mrf.mxu3 }
 0x3cb   : > { %v455_v59 = vpack.c.bf16 %v451_v58, %v451_v58 }
 0x3cd   : > { %460 = vrot.lane.b32.xlu0 %v455_v59, %s728_s4  ;;  %v533_v60 = vpop.f32.mrf.mxu2 }
 0x3ce   : > { %v537_v61 = vpack.c.bf16 %v533_v60, %v533_v60 }
 0x3d0   : > { %542 = vrot.lane.b32.xlu2 %v537_v61, %s729_s5 }
 0x41f   : > { %v459_v62 = vpop.permute.xlu2 %458 }
 0x420   : > { %465 = vst.msk [vmem:[%s806_s29] sm:$0xf] %vm464_vm4, %v459_v62 }
 0x42a   : > { %v543_v1 = vpop.permute.xlu2 %542 }
 0x43a   : > { %v541_v63 = vpop.permute.xlu1 %540 }
 0x43b   : > { %547 = vst.msk [vmem:[%s806_s29] sm:$0xf] %vm546_vm5, %v541_v63 }
 0x43f   : > { %v461_v0 = vpop.permute.xlu0 %460 }
 0x440   : > { %466 = vst.msk [vmem:[%s806_s29 + $0x4] sm:$0xf] %vm464_vm4, %v461_v0 }
 0x441   : > { %548 = vst.msk [vmem:[%s806_s29 + $0x4] sm:$0xf] %vm546_vm5, %v543_v1 }
 0x442 PF: > { %s13_s12 = sadd.s32 1, %s722_s12  }
 0x443   : > { %p10_p4 = scmp.ge.s32.totalorder %s13_s12, 4  }
 0x445   :  { %12 = sbr.rel (!%p10_p4) target bundleno = 1 (0x1), region = 68 }

</bundles_post_ra>
